<compile_context>
chip_gen: v7x
topology: tpu7x:2x2x1
jax: 0.10.0
libtpu: 0.0.40
codegen_flags: <defaults>
</compile_context>

<pallas_src>
import functools

import jax
import jax.numpy as jnp
from jax.experimental import pallas as pl
from jax.experimental.pallas import tpu as pltpu


def conv_out_len(w, k, stride, pad):
    return (w + 2 * pad - k) // stride + 1


# ----------------------------------------------------------------------------
# Static slot layout: store a conv layer's INPUT activations grouped by residue
# class (q % stride) with lead/trail zero slots, so that every tap t reads one
# contiguous (W_out*HB, Cin) slab => one MXU matmul per tap.
# ----------------------------------------------------------------------------
def conv_slab_layout(w_in, w_out, k, stride, pad):
    res = [(t - pad) % stride for t in range(k)]
    off = [(t - pad) // stride for t in range(k)]                 # floor division
    n_r = [max(0, -(-(w_in - r) // stride)) for r in range(stride)]
    lead, trail = [], []
    for r in range(stride):
        offs = [off[t] for t in range(k) if res[t] == r]
        lead.append(max(0, -min(offs)) if offs else 0)
        trail.append(max([0] + [o + w_out - n_r[r] for o in offs]))
    block_start, total = [], 0
    for r in range(stride):
        block_start.append(total)
        total += lead[r] + n_r[r] + trail[r]
    slab_start = [block_start[res[t]] + lead[res[t]] + off[t] for t in range(k)]
    pos_slot = [block_start[q % stride] + lead[q % stride] + q // stride
                for q in range(w_in)]
    zero_slots = sorted(set(range(total)) - set(pos_slot))
    for s in slab_start:
        assert 0 <= s and s + w_out <= total
    return dict(total=total, slab_start=tuple(slab_start),
                pos_slot=tuple(pos_slot), zero_slots=tuple(zero_slots))


def real_slot_runs(pos_slot):
    """Maximal consecutive runs of the (sorted) real slots -> contiguous stores."""
    slots = sorted(pos_slot)
    runs, start, prev = [], slots[0], slots[0]
    for s in slots[1:]:
        if s == prev + 1:
            prev = s
        else:
            runs.append((start, prev - start + 1))
            start = prev = s
    runs.append((start, prev - start + 1))
    return tuple(runs)


# ----------------------------------------------------------------------------
# Fused kernel: conv1+BN+ReLU -> conv2+BN+ReLU -> conv3+BN+ReLU -> FC (one launch)
# Activation rows are (position, h*B + b); channels sit on the 128-lane axis.
# ----------------------------------------------------------------------------
def har_cnn_fused_kernel(
    xcol_ref,      # (W1*HB, kp)       f32   layer-1 im2col, rows in act1 slot order
    w1_ref,        # (kp, C1)          f32   conv1 taps (BN scale folded, zero tap pad)
    s1_ref,        # (1, C1)           f32
    w2_ref,        # (k, C1, C2)       mxu
    s2_ref,        # (1, C2)           f32
    w3_ref,        # (k, C2, C3)       mxu
    s3_ref,        # (1, C3)           f32
    fcw_ref,       # (C3, G*n_pad)     mxu   FC weights grouped by g = h*W3 + w
    fcb_ref,       # (1, n_pad)        f32
    conv_out_ref,  # (W3*HB, C3)       f32   OUTPUT: last conv act, row = w*HB + h*B + b
    logits_ref,    # (B, num_classes)  f32   OUTPUT
    act1_ref,      # (P1*HB, C1)       scratch, mxu dtype
    act2_ref,      # (P2*HB, C2)       scratch, mxu dtype
    *, B, H, k, widths, n_pad, num_classes,
    l2_slabs, l2_runs, l2_zero, l3_slabs, l3_pos_slot, l3_zero):
    W0, W1, W2, W3 = widths
    HB = H * B
    f32 = jnp.float32
    mxu = act1_ref.dtype
    C1 = act1_ref.shape[1]
    C2 = act2_ref.shape[1]

    # ---- layer 1: ONE (W1*HB, kp) @ (kp, C1) matmul, + shift, ReLU.
    y1 = jnp.dot(xcol_ref[...], w1_ref[...], preferred_element_type=f32)
    y1 = jnp.maximum(y1 + s1_ref[...], 0.0).astype(mxu)
    row = 0                                  # rows already in act1 slot order
    for slot0, nslots in l2_runs:
        act1_ref[pl.ds(slot0 * HB, nslots * HB), :] = y1[row:row + nslots * HB, :]
        row += nslots * HB
    for z in l2_zero:                        # zero-padding slots (out-of-range taps)
        act1_ref[pl.ds(z * HB, HB), :] = jnp.zeros((HB, C1), mxu)

    # ---- layer 2: k slab matmuls, M = W2*HB, f32 accumulate, + shift, ReLU.
    acc2 = None
    for t in range(k):
        part = jnp.dot(act1_ref[pl.ds(l2_slabs[t] * HB, W2 * HB), :], w2_ref[t],
                       preferred_element_type=f32)
        acc2 = part if acc2 is None else acc2 + part
    y2 = jnp.maximum(acc2 + s2_ref[...], 0.0).astype(mxu)
    for q in range(W2):                      # scatter output positions into act2 slots
        act2_ref[pl.ds(l3_pos_slot[q] * HB, HB), :] = y2[q * HB:(q + 1) * HB, :]
    for z in l3_zero:
        act2_ref[pl.ds(z * HB, HB), :] = jnp.zeros((HB, C2), mxu)

    # ---- layer 3: k slab matmuls, M = W3*HB; f32 result is also the features output.
    acc3 = None
    for t in range(k):
        part = jnp.dot(act2_ref[pl.ds(l3_slabs[t] * HB, W3 * HB), :], w3_ref[t],
                       preferred_element_type=f32)
        acc3 = part if acc3 is None else acc3 + part
    y3 = jnp.maximum(acc3 + s3_ref[...], 0.0)          # (W3*HB, C3) f32
    conv_out_ref[...] = y3

    # ---- FC fused on the fresh f32 activations (cast once):
    #      P[r, g*n_pad + n] = sum_c y3[r, c] * Wfc[(h,w)=g, c, n];  row r = w*HB + h*B + b.
    #      logits[b] = sum_{w,h} P[w*HB + h*B + b, (h*W3+w)*n_pad : +n_pad]  + bias.
    fc_p = jnp.dot(y3.astype(mxu), fcw_ref[...], preferred_element_type=f32)
    acc = None
    for w_pos in range(W3):
        for h_pos in range(H):
            g = h_pos * W3 + w_pos
            r0 = w_pos * HB + h_pos * B
            blk = fc_p[r0:r0 + B, g * n_pad:(g + 1) * n_pad]
            acc = blk if acc is None else acc + blk
    logits_ref[...] = (acc + fcb_ref[...])[:, :num_classes]


# ----------------------------------------------------------------------------
# One-time parameter preparation (BN fold, layout permutations, lane padding)
# ----------------------------------------------------------------------------
def prepare_params(params, H, W3, num_classes, mxu_dtype=jnp.bfloat16,
                   eps=1e-5, n_pad=8):
    convs = params["convs"]
    prepped = {}
    for li, layer in enumerate(convs, start=1):
        scale = layer["gamma"] / jnp.sqrt(layer["var"] + eps)          # BN fold
        shift = layer["beta"] + (layer["b"] - layer["mean"]) * scale
        w_taps = jnp.transpose(layer["w"][:, :, 0, :], (2, 1, 0))      # (k, Cin, Cout)
        w_taps = w_taps * scale[None, None, :]
        if li == 1:
            w1 = w_taps[:, 0, :]                                       # (k, C1), Cin=1
            kp = ((w1.shape[0] + 7) // 8) * 8
            w1 = jnp.pad(w1, ((0, kp - w1.shape[0]), (0, 0)))
            prepped["w1"] = w1.astype(jnp.float32)                     # tiny; keep exact
        else:
            prepped[f"w{li}"] = w_taps.astype(mxu_dtype)
        prepped[f"s{li}"] = shift.reshape(1, -1).astype(jnp.float32)

    C3 = convs[-1]["w"].shape[0]
    G = H * W3
    # fc_w is (ncls, C3*H*W3) in torch NCHW-flatten order; regroup per (h, w) and pad the
    # class dim 6 -> n_pad=8 lanes only (was 128): fcw_big[c, g*n_pad + n] with g = h*W3+w.
    fcw = params["fc_w"].reshape(num_classes, C3, H, W3)
    fcw = jnp.transpose(fcw, (2, 3, 1, 0)).reshape(G, C3, num_classes)
    fcw = jnp.pad(fcw, ((0, 0), (0, 0), (0, n_pad - num_classes)))
    prepped["fcw"] = jnp.transpose(fcw, (1, 0, 2)).reshape(C3, G * n_pad).astype(mxu_dtype)
    prepped["fcb"] = jnp.pad(params["fc_b"], (0, n_pad - num_classes)
                             ).reshape(1, n_pad).astype(jnp.float32)
    return prepped


# ----------------------------------------------------------------------------
# Forward pass wrapper (single pallas_call)
# ----------------------------------------------------------------------------
def har_cnn_forward(x, prepped, *, k, stride, pad, num_classes):
    B, Cin, H, W0 = x.shape
    assert Cin == 1
    widths = [W0]
    for _ in range(3):
        widths.append(conv_out_len(widths[-1], k, stride, pad))
    W0, W1, W2, W3 = widths
    HB = H * B
    C1 = prepped["w1"].shape[1]
    C2 = prepped["w2"].shape[2]
    C3 = prepped["w3"].shape[2]
    kp = prepped["w1"].shape[0]
    n_pad = prepped["fcb"].shape[1]
    G = H * W3
    mxu_dtype = prepped["w2"].dtype

    layout2 = conv_slab_layout(W1, W2, k, stride, pad)   # layout of act1 (conv2 input)
    layout3 = conv_slab_layout(W2, W3, k, stride, pad)   # layout of act2 (conv3 input)
    l2_runs = real_slot_runs(layout2["pos_slot"])
    P1, P2 = layout2["total"], layout3["total"]

    # Only wrapper-side data-prep op: layer-1 im2col (tiny), rows ordered so the kernel
    # stores y1 with a couple of contiguous writes straight into act1's slot layout.
    pos_order = sorted(range(W1), key=lambda q: layout2["pos_slot"][q])
    xp = jnp.pad(x.reshape(B, H, W0).astype(jnp.float32), ((0, 0), (0, 0), (pad, pad)))
    cols = stride * jnp.asarray(pos_order)[:, None] + jnp.arange(k)[None, :]   # (W1, k)
    xcol = jnp.transpose(xp[:, :, cols], (2, 1, 0, 3)).reshape(W1 * HB, k)
    if kp > k:
        xcol = jnp.pad(xcol, ((0, 0), (0, kp - k)))

    kernel = functools.partial(
        har_cnn_fused_kernel, B=B, H=H, k=k, widths=tuple(widths),
        n_pad=n_pad, num_classes=num_classes,
        l2_slabs=layout2["slab_start"], l2_runs=l2_runs, l2_zero=layout2["zero_slots"],
        l3_slabs=layout3["slab_start"], l3_pos_slot=layout3["pos_slot"],
        l3_zero=layout3["zero_slots"])

    conv_out, logits = pl.pallas_call(
        kernel,
        out_shape=(
            jax.ShapeDtypeStruct((W3 * HB, C3), jnp.float32),
            jax.ShapeDtypeStruct((B, num_classes), jnp.float32),
        ),
        grid=(1,),
        in_specs=[
            pl.BlockSpec((W1 * HB, kp), lambda i: (0, 0)),
            pl.BlockSpec((kp, C1), lambda i: (0, 0)),
            pl.BlockSpec((1, C1), lambda i: (0, 0)),
            pl.BlockSpec((k, C1, C2), lambda i: (0, 0, 0)),
            pl.BlockSpec((1, C2), lambda i: (0, 0)),
            pl.BlockSpec((k, C2, C3), lambda i: (0, 0, 0)),
            pl.BlockSpec((1, C3), lambda i: (0, 0)),
            pl.BlockSpec((C3, G * n_pad), lambda i: (0, 0)),
            pl.BlockSpec((1, n_pad), lambda i: (0, 0)),
        ],
        out_specs=(
            pl.BlockSpec((W3 * HB, C3), lambda i: (0, 0)),
            pl.BlockSpec((B, num_classes), lambda i: (0, 0)),
        ),
        scratch_shapes=[
            pltpu.VMEM((P1 * HB, C1), mxu_dtype),
            pltpu.VMEM((P2 * HB, C2), mxu_dtype),
        ],
        # NOTE: for large batches add a leading "parallel" batch axis so v7x's two
        # TensorCores split the work; at B=2 everything fits one sub-microsecond launch.
        compiler_params=pltpu.CompilerParams(dimension_semantics=("arbitrary",)),
    )(xcol, prepped["w1"], prepped["s1"], prepped["w2"], prepped["s2"],
      prepped["w3"], prepped["s3"], prepped["fcw"], prepped["fcb"])

    # Torch-order flatten of the (tiny, 16 KB) feature tensor; kept in the wrapper because
    # an in-kernel lane<->flatten transpose would cost more than this single small XLA op.
    features = jnp.transpose(conv_out.reshape(W3, H, B, C3),
                             (2, 3, 1, 0)).reshape(B, C3 * H * W3)
    return logits, features


# ----------------------------------------------------------------------------
# Pure-JAX reference (correctness check)
# ----------------------------------------------------------------------------
def ref_forward(x, params, stride, pad, eps=1e-5):
    h = x
    for layer in params["convs"]:
        y = jax.lax.conv_general_dilated(
            h, layer["w"], window_strides=(1, stride),
            padding=((0, 0), (pad, pad)),
            dimension_numbers=("NCHW", "OIHW", "NCHW"),
            precision=jax.lax.Precision.HIGHEST)
        y = y + layer["b"][None, :, None, None]
        y = (y - layer["mean"][None, :, None, None]) / jnp.sqrt(
            layer["var"][None, :, None, None] + eps)
        y = y * layer["gamma"][None, :, None, None] + layer["beta"][None, :, None, None]
        h = jnp.maximum(y, 0.0)
    B = h.shape[0]
    feats = h.reshape(B, -1)
    logits = feats @ params["fc_w"].T + params["fc_b"]
    return logits, feats


# ----------------------------------------------------------------------------
# Deterministic parameter init (shapes follow HAR_CNN.__init__, dataset='PAMAP2',
# small kernel: kernel=(1,3), stride=(1,2), padding=(0,1); BN in eval mode)
# ----------------------------------------------------------------------------
def init_params(key, channels, k, num_classes, flatten_size):
    params = {"convs": []}
    c_in = 1
    for c_out in channels:
        key, k1, k2, k3, k4, k5, k6 = jax.random.split(key, 7)
        params["convs"].append(dict(
            w=0.1 * jax.random.normal(k1, (c_out, c_in, 1, k), jnp.float32),
            b=0.1 * jax.random.normal(k2, (c_out,), jnp.float32),
            gamma=1.0 + 0.1 * jax.random.normal(k3, (c_out,), jnp.float32),
            beta=0.1 * jax.random.normal(k4, (c_out,), jnp.float32),
            mean=0.1 * jax.random.normal(k5, (c_out,), jnp.float32),
            var=0.5 + jax.random.uniform(k6, (c_out,), jnp.float32),
        ))
        c_in = c_out
    key, k1, k2 = jax.random.split(key, 3)
    params["fc_w"] = 0.05 * jax.random.normal(k1, (num_classes, flatten_size), jnp.float32)
    params["fc_b"] = 0.05 * jax.random.normal(k2, (num_classes,), jnp.float32)
    return params


if __name__ == "__main__":
    # HAR_CNN(dataset='PAMAP2', num_classes=6, input_shape=(4, 16), largeKernal=False)
    # TODO(synk): other dataset configs (stride 3 / large kernels) reuse the same layout
    # helper but are not exercised here.
    k, stride, pad = 3, 2, 1
    channels = (64, 128, 256)
    num_classes = 6
    batch, H, W = 2, 4, 16

    widths = [W]
    for _ in channels:
        widths.append(conv_out_len(widths[-1], k, stride, pad))
    flatten_size = channels[-1] * H * widths[-1]        # 256 * 4 * 2 = 2048

    key = jax.random.PRNGKey(0)
    key, kx = jax.random.split(key)
    x = jax.random.normal(kx, (batch, 1, H, W), jnp.float32)     # NCHW like PyTorch

    params = init_params(key, channels, k, num_classes, flatten_size)
    ref_logits, ref_feats = ref_forward(x, params, stride, pad)

    fwd = jax.jit(functools.partial(har_cnn_forward, k=k, stride=stride, pad=pad,
                                    num_classes=num_classes))

    # Default path: bf16 MXU operands on every generation, f32 accumulate + f32 epilogue.
    prepped_bf16 = prepare_params(params, H, widths[-1], num_classes)
    logits_b, feats_b = fwd(x, prepped_bf16)
    logits_b = jax.block_until_ready(logits_b)
    feats_b = jax.block_until_ready(feats_b)
    assert logits_b.shape == (batch, num_classes)
    assert feats_b.shape == (batch, flatten_size)
    assert jnp.allclose(feats_b, ref_feats, rtol=5e-2, atol=5e-2)
    assert jnp.allclose(logits_b, ref_logits, rtol=5e-2, atol=5e-2)

    # f32 correctness-check path (tight tolerance).
    prepped_f32 = prepare_params(params, H, widths[-1], num_classes,
                                 mxu_dtype=jnp.float32)
    logits, feats = fwd(x, prepped_f32)
    logits = jax.block_until_ready(logits)
    feats = jax.block_until_ready(feats)
    assert jnp.allclose(feats, ref_feats, rtol=2e-3, atol=2e-3)
    assert jnp.allclose(logits, ref_logits, rtol=2e-3, atol=2e-3)

    print("KERNEL_OK")
</pallas_src>

<mosaic_0001>
module attributes {stable_mosaic.version = 11 : i64} {
  func.func @har_cnn_fused_kernel(%arg0: i32, %arg1: memref<64x8xf32, #tpu.memory_space<vmem>>, %arg2: memref<8x64xf32, #tpu.memory_space<vmem>>, %arg3: memref<1x64xf32, #tpu.memory_space<vmem>>, %arg4: memref<3x64x128xbf16, #tpu.memory_space<vmem>>, %arg5: memref<1x128xf32, #tpu.memory_space<vmem>>, %arg6: memref<3x128x256xbf16, #tpu.memory_space<vmem>>, %arg7: memref<1x256xf32, #tpu.memory_space<vmem>>, %arg8: memref<256x64xbf16, #tpu.memory_space<vmem>>, %arg9: memref<1x8xf32, #tpu.memory_space<vmem>>, %arg10: memref<16x256xf32, #tpu.memory_space<vmem>>, %arg11: memref<2x6xf32, #tpu.memory_space<vmem>>, %arg12: memref<72x64xbf16, #tpu.memory_space<vmem>>, %arg13: memref<40x128xbf16, #tpu.memory_space<vmem>>) attributes {dimension_semantics = [#tpu.dimension_semantics<arbitrary>], iteration_bounds = array<i64: 1>, scalar_prefetch = 0 : i64, scratch_operands = 2 : i64, tpu.core_type = #tpu.core_type<tc>, window_params = [{pipeline_mode = #tpu.pipeline_mode<synchronous>, transform_indices = @transform_0, window_bounds = array<i64: 64, 8>}, {pipeline_mode = #tpu.pipeline_mode<synchronous>, transform_indices = @transform_1, window_bounds = array<i64: 8, 64>}, {pipeline_mode = #tpu.pipeline_mode<synchronous>, transform_indices = @transform_2, window_bounds = array<i64: 1, 64>}, {pipeline_mode = #tpu.pipeline_mode<synchronous>, transform_indices = @transform_3, window_bounds = array<i64: 3, 64, 128>}, {pipeline_mode = #tpu.pipeline_mode<synchronous>, transform_indices = @transform_4, window_bounds = array<i64: 1, 128>}, {pipeline_mode = #tpu.pipeline_mode<synchronous>, transform_indices = @transform_5, window_bounds = array<i64: 3, 128, 256>}, {pipeline_mode = #tpu.pipeline_mode<synchronous>, transform_indices = @transform_6, window_bounds = array<i64: 1, 256>}, {pipeline_mode = #tpu.pipeline_mode<synchronous>, transform_indices = @transform_7, window_bounds = array<i64: 256, 64>}, {pipeline_mode = #tpu.pipeline_mode<synchronous>, transform_indices = @transform_8, window_bounds = array<i64: 1, 8>}, {pipeline_mode = #tpu.pipeline_mode<synchronous>, transform_indices = @transform_9, window_bounds = array<i64: 16, 256>}, {pipeline_mode = #tpu.pipeline_mode<synchronous>, transform_indices = @transform_10, window_bounds = array<i64: 2, 6>}]} {
    %c0 = arith.constant 0 : index
    %c0_0 = arith.constant 0 : index
    %0 = vector.load %arg1[%c0, %c0_0] : memref<64x8xf32, #tpu.memory_space<vmem>>, vector<64x8xf32>
    %c0_1 = arith.constant 0 : index
    %c0_2 = arith.constant 0 : index
    %1 = vector.load %arg2[%c0_1, %c0_2] : memref<8x64xf32, #tpu.memory_space<vmem>>, vector<8x64xf32>
    %cst = arith.constant dense<0.000000e+00> : vector<64x64xf32>
    %2 = tpu.matmul %0, %1, %cst {dimension_numbers = #tpu.dot_dimension_numbers<[1], [0], [0], [1], [0, 0, 1, 1], [], []>} : vector<64x8xf32>, vector<8x64xf32>, vector<64x64xf32> -> vector<64x64xf32>
    %c0_3 = arith.constant 0 : index
    %c0_4 = arith.constant 0 : index
    %3 = vector.load %arg3[%c0_3, %c0_4] : memref<1x64xf32, #tpu.memory_space<vmem>>, vector<1x64xf32>
    %4 = vector.broadcast %3 : vector<1x64xf32> to vector<64x64xf32>
    %5 = arith.addf %2, %4 : vector<64x64xf32>
    %cst_5 = arith.constant 0.000000e+00 : f32
    %6 = vector.broadcast %cst_5 : f32 to vector<64x64xf32>
    %7 = arith.maximumf %5, %6 : vector<64x64xf32>
    %8 = arith.truncf %7 : vector<64x64xf32> to vector<64x64xbf16>
    %9 = vector.extract_strided_slice %8 {offsets = [0, 0], sizes = [32, 64], strides = [1, 1]} : vector<64x64xbf16> to vector<32x64xbf16>
    %c0_6 = arith.constant 0 : index
    %c0_7 = arith.constant 0 : index
    %10 = vector.load %arg12[%c0_6, %c0_7] : memref<72x64xbf16, #tpu.memory_space<vmem>>, vector<32x64xbf16>
    tpu.vector_store %arg12[%c0_6, %c0_7], %9 {strides = array<i32>} : memref<72x64xbf16, #tpu.memory_space<vmem>>, vector<32x64xbf16>,
    %11 = vector.extract_strided_slice %8 {offsets = [32, 0], sizes = [32, 64], strides = [1, 1]} : vector<64x64xbf16> to vector<32x64xbf16>
    %c40 = arith.constant 40 : index
    %c0_8 = arith.constant 0 : index
    %12 = vector.load %arg12[%c40, %c0_8] : memref<72x64xbf16, #tpu.memory_space<vmem>>, vector<32x64xbf16>
    tpu.vector_store %arg12[%c40, %c0_8], %11 {strides = array<i32>} : memref<72x64xbf16, #tpu.memory_space<vmem>>, vector<32x64xbf16>,
    %cst_9 = arith.constant 0.000000e+00 : bf16
    %13 = vector.broadcast %cst_9 : bf16 to vector<8x64xbf16>
    %c32 = arith.constant 32 : index
    %c0_10 = arith.constant 0 : index
    %14 = vector.load %arg12[%c32, %c0_10] : memref<72x64xbf16, #tpu.memory_space<vmem>>, vector<8x64xbf16>
    tpu.vector_store %arg12[%c32, %c0_10], %13 {strides = array<i32>} : memref<72x64xbf16, #tpu.memory_space<vmem>>, vector<8x64xbf16>,
    %c32_11 = arith.constant 32 : index
    %c0_12 = arith.constant 0 : index
    %15 = vector.load %arg12[%c32_11, %c0_12] : memref<72x64xbf16, #tpu.memory_space<vmem>>, vector<32x64xbf16>
    %c0_13 = arith.constant 0 : index
    %c0_14 = arith.constant 0 : index
    %c0_15 = arith.constant 0 : index
    %16 = vector.load %arg4[%c0_13, %c0_14, %c0_15] : memref<3x64x128xbf16, #tpu.memory_space<vmem>>, vector<1x64x128xbf16>
    %17 = vector.shape_cast %16 : vector<1x64x128xbf16> to vector<64x128xbf16>
    %cst_16 = arith.constant dense<0.000000e+00> : vector<32x128xf32>
    %18 = tpu.matmul %15, %17, %cst_16 {dimension_numbers = #tpu.dot_dimension_numbers<[1], [0], [0], [1], [0, 0, 1, 1], [], []>} : vector<32x64xbf16>, vector<64x128xbf16>, vector<32x128xf32> -> vector<32x128xf32>
    %c0_17 = arith.constant 0 : index
    %c0_18 = arith.constant 0 : index
    %19 = vector.load %arg12[%c0_17, %c0_18] : memref<72x64xbf16, #tpu.memory_space<vmem>>, vector<32x64xbf16>
    %c1 = arith.constant 1 : index
    %c0_19 = arith.constant 0 : index
    %c0_20 = arith.constant 0 : index
    %20 = vector.load %arg4[%c1, %c0_19, %c0_20] : memref<3x64x128xbf16, #tpu.memory_space<vmem>>, vector<1x64x128xbf16>
    %21 = vector.shape_cast %20 : vector<1x64x128xbf16> to vector<64x128xbf16>
    %cst_21 = arith.constant dense<0.000000e+00> : vector<32x128xf32>
    %22 = tpu.matmul %19, %21, %cst_21 {dimension_numbers = #tpu.dot_dimension_numbers<[1], [0], [0], [1], [0, 0, 1, 1], [], []>} : vector<32x64xbf16>, vector<64x128xbf16>, vector<32x128xf32> -> vector<32x128xf32>
    %23 = arith.addf %18, %22 : vector<32x128xf32>
    %c40_22 = arith.constant 40 : index
    %c0_23 = arith.constant 0 : index
    %24 = vector.load %arg12[%c40_22, %c0_23] : memref<72x64xbf16, #tpu.memory_space<vmem>>, vector<32x64xbf16>
    %c2 = arith.constant 2 : index
    %c0_24 = arith.constant 0 : index
    %c0_25 = arith.constant 0 : index
    %25 = vector.load %arg4[%c2, %c0_24, %c0_25] : memref<3x64x128xbf16, #tpu.memory_space<vmem>>, vector<1x64x128xbf16>
    %26 = vector.shape_cast %25 : vector<1x64x128xbf16> to vector<64x128xbf16>
    %cst_26 = arith.constant dense<0.000000e+00> : vector<32x128xf32>
    %27 = tpu.matmul %24, %26, %cst_26 {dimension_numbers = #tpu.dot_dimension_numbers<[1], [0], [0], [1], [0, 0, 1, 1], [], []>} : vector<32x64xbf16>, vector<64x128xbf16>, vector<32x128xf32> -> vector<32x128xf32>
    %28 = arith.addf %23, %27 : vector<32x128xf32>
    %c0_27 = arith.constant 0 : index
    %c0_28 = arith.constant 0 : index
    %29 = vector.load %arg5[%c0_27, %c0_28] : memref<1x128xf32, #tpu.memory_space<vmem>>, vector<1x128xf32>
    %30 = vector.broadcast %29 : vector<1x128xf32> to vector<32x128xf32>
    %31 = arith.addf %28, %30 : vector<32x128xf32>
    %cst_29 = arith.constant 0.000000e+00 : f32
    %32 = vector.broadcast %cst_29 : f32 to vector<32x128xf32>
    %33 = arith.maximumf %31, %32 : vector<32x128xf32>
    %34 = arith.truncf %33 : vector<32x128xf32> to vector<32x128xbf16>
    %35 = vector.extract_strided_slice %34 {offsets = [0, 0], sizes = [8, 128], strides = [1, 1]} : vector<32x128xbf16> to vector<8x128xbf16>
    %c0_30 = arith.constant 0 : index
    %c0_31 = arith.constant 0 : index
    %36 = vector.load %arg13[%c0_30, %c0_31] : memref<40x128xbf16, #tpu.memory_space<vmem>>, vector<8x128xbf16>
    tpu.vector_store %arg13[%c0_30, %c0_31], %35 {strides = array<i32>} : memref<40x128xbf16, #tpu.memory_space<vmem>>, vector<8x128xbf16>,
    %37 = vector.extract_strided_slice %34 {offsets = [8, 0], sizes = [8, 128], strides = [1, 1]} : vector<32x128xbf16> to vector<8x128xbf16>
    %c24 = arith.constant 24 : index
    %c0_32 = arith.constant 0 : index
    %38 = vector.load %arg13[%c24, %c0_32] : memref<40x128xbf16, #tpu.memory_space<vmem>>, vector<8x128xbf16>
    tpu.vector_store %arg13[%c24, %c0_32], %37 {strides = array<i32>} : memref<40x128xbf16, #tpu.memory_space<vmem>>, vector<8x128xbf16>,
    %39 = vector.extract_strided_slice %34 {offsets = [16, 0], sizes = [8, 128], strides = [1, 1]} : vector<32x128xbf16> to vector<8x128xbf16>
    %c8 = arith.constant 8 : index
    %c0_33 = arith.constant 0 : index
    %40 = vector.load %arg13[%c8, %c0_33] : memref<40x128xbf16, #tpu.memory_space<vmem>>, vector<8x128xbf16>
    tpu.vector_store %arg13[%c8, %c0_33], %39 {strides = array<i32>} : memref<40x128xbf16, #tpu.memory_space<vmem>>, vector<8x128xbf16>,
    %41 = vector.extract_strided_slice %34 {offsets = [24, 0], sizes = [8, 128], strides = [1, 1]} : vector<32x128xbf16> to vector<8x128xbf16>
    %c32_34 = arith.constant 32 : index
    %c0_35 = arith.constant 0 : index
    %42 = vector.load %arg13[%c32_34, %c0_35] : memref<40x128xbf16, #tpu.memory_space<vmem>>, vector<8x128xbf16>
    tpu.vector_store %arg13[%c32_34, %c0_35], %41 {strides = array<i32>} : memref<40x128xbf16, #tpu.memory_space<vmem>>, vector<8x128xbf16>,
    %cst_36 = arith.constant 0.000000e+00 : bf16
    %43 = vector.broadcast %cst_36 : bf16 to vector<8x128xbf16>
    %c16 = arith.constant 16 : index
    %c0_37 = arith.constant 0 : index
    %44 = vector.load %arg13[%c16, %c0_37] : memref<40x128xbf16, #tpu.memory_space<vmem>>, vector<8x128xbf16>
    tpu.vector_store %arg13[%c16, %c0_37], %43 {strides = array<i32>} : memref<40x128xbf16, #tpu.memory_space<vmem>>, vector<8x128xbf16>,
    %c16_38 = arith.constant 16 : index
    %c0_39 = arith.constant 0 : index
    %45 = vector.load %arg13[%c16_38, %c0_39] : memref<40x128xbf16, #tpu.memory_space<vmem>>, vector<16x128xbf16>
    %c0_40 = arith.constant 0 : index
    %c0_41 = arith.constant 0 : index
    %c0_42 = arith.constant 0 : index
    %46 = vector.load %arg6[%c0_40, %c0_41, %c0_42] : memref<3x128x256xbf16, #tpu.memory_space<vmem>>, vector<1x128x256xbf16>
    %47 = vector.shape_cast %46 : vector<1x128x256xbf16> to vector<128x256xbf16>
    %cst_43 = arith.constant dense<0.000000e+00> : vector<16x256xf32>
    %48 = tpu.matmul %45, %47, %cst_43 {dimension_numbers = #tpu.dot_dimension_numbers<[1], [0], [0], [1], [0, 0, 1, 1], [], []>} : vector<16x128xbf16>, vector<128x256xbf16>, vector<16x256xf32> -> vector<16x256xf32>
    %c0_44 = arith.constant 0 : index
    %c0_45 = arith.constant 0 : index
    %49 = vector.load %arg13[%c0_44, %c0_45] : memref<40x128xbf16, #tpu.memory_space<vmem>>, vector<16x128xbf16>
    %c1_46 = arith.constant 1 : index
    %c0_47 = arith.constant 0 : index
    %c0_48 = arith.constant 0 : index
    %50 = vector.load %arg6[%c1_46, %c0_47, %c0_48] : memref<3x128x256xbf16, #tpu.memory_space<vmem>>, vector<1x128x256xbf16>
    %51 = vector.shape_cast %50 : vector<1x128x256xbf16> to vector<128x256xbf16>
    %cst_49 = arith.constant dense<0.000000e+00> : vector<16x256xf32>
    %52 = tpu.matmul %49, %51, %cst_49 {dimension_numbers = #tpu.dot_dimension_numbers<[1], [0], [0], [1], [0, 0, 1, 1], [], []>} : vector<16x128xbf16>, vector<128x256xbf16>, vector<16x256xf32> -> vector<16x256xf32>
    %53 = arith.addf %48, %52 : vector<16x256xf32>
    %c24_50 = arith.constant 24 : index
    %c0_51 = arith.constant 0 : index
    %54 = vector.load %arg13[%c24_50, %c0_51] : memref<40x128xbf16, #tpu.memory_space<vmem>>, vector<16x128xbf16>
    %c2_52 = arith.constant 2 : index
    %c0_53 = arith.constant 0 : index
    %c0_54 = arith.constant 0 : index
    %55 = vector.load %arg6[%c2_52, %c0_53, %c0_54] : memref<3x128x256xbf16, #tpu.memory_space<vmem>>, vector<1x128x256xbf16>
    %56 = vector.shape_cast %55 : vector<1x128x256xbf16> to vector<128x256xbf16>
    %cst_55 = arith.constant dense<0.000000e+00> : vector<16x256xf32>
    %57 = tpu.matmul %54, %56, %cst_55 {dimension_numbers = #tpu.dot_dimension_numbers<[1], [0], [0], [1], [0, 0, 1, 1], [], []>} : vector<16x128xbf16>, vector<128x256xbf16>, vector<16x256xf32> -> vector<16x256xf32>
    %58 = arith.addf %53, %57 : vector<16x256xf32>
    %c0_56 = arith.constant 0 : index
    %c0_57 = arith.constant 0 : index
    %59 = vector.load %arg7[%c0_56, %c0_57] : memref<1x256xf32, #tpu.memory_space<vmem>>, vector<1x256xf32>
    %60 = vector.broadcast %59 : vector<1x256xf32> to vector<16x256xf32>
    %61 = arith.addf %58, %60 : vector<16x256xf32>
    %cst_58 = arith.constant 0.000000e+00 : f32
    %62 = vector.broadcast %cst_58 : f32 to vector<16x256xf32>
    %63 = arith.maximumf %61, %62 : vector<16x256xf32>
    %c0_59 = arith.constant 0 : index
    %c0_60 = arith.constant 0 : index
    %64 = vector.load %arg10[%c0_59, %c0_60] : memref<16x256xf32, #tpu.memory_space<vmem>>, vector<16x256xf32>
    tpu.vector_store %arg10[%c0_59, %c0_60], %63 {strides = array<i32>} : memref<16x256xf32, #tpu.memory_space<vmem>>, vector<16x256xf32>,
    %65 = arith.truncf %63 : vector<16x256xf32> to vector<16x256xbf16>
    %c0_61 = arith.constant 0 : index
    %c0_62 = arith.constant 0 : index
    %66 = vector.load %arg8[%c0_61, %c0_62] : memref<256x64xbf16, #tpu.memory_space<vmem>>, vector<256x64xbf16>
    %cst_63 = arith.constant dense<0.000000e+00> : vector<16x64xf32>
    %67 = tpu.matmul %65, %66, %cst_63 {dimension_numbers = #tpu.dot_dimension_numbers<[1], [0], [0], [1], [0, 0, 1, 1], [], []>} : vector<16x256xbf16>, vector<256x64xbf16>, vector<16x64xf32> -> vector<16x64xf32>
    %68 = vector.extract_strided_slice %67 {offsets = [0, 0], sizes = [2, 8], strides = [1, 1]} : vector<16x64xf32> to vector<2x8xf32>
    %69 = vector.extract_strided_slice %67 {offsets = [2, 16], sizes = [2, 8], strides = [1, 1]} : vector<16x64xf32> to vector<2x8xf32>
    %70 = arith.addf %68, %69 : vector<2x8xf32>
    %71 = vector.extract_strided_slice %67 {offsets = [4, 32], sizes = [2, 8], strides = [1, 1]} : vector<16x64xf32> to vector<2x8xf32>
    %72 = arith.addf %70, %71 : vector<2x8xf32>
    %73 = vector.extract_strided_slice %67 {offsets = [6, 48], sizes = [2, 8], strides = [1, 1]} : vector<16x64xf32> to vector<2x8xf32>
    %74 = arith.addf %72, %73 : vector<2x8xf32>
    %75 = vector.extract_strided_slice %67 {offsets = [8, 8], sizes = [2, 8], strides = [1, 1]} : vector<16x64xf32> to vector<2x8xf32>
    %76 = arith.addf %74, %75 : vector<2x8xf32>
    %77 = vector.extract_strided_slice %67 {offsets = [10, 24], sizes = [2, 8], strides = [1, 1]} : vector<16x64xf32> to vector<2x8xf32>
    %78 = arith.addf %76, %77 : vector<2x8xf32>
    %79 = vector.extract_strided_slice %67 {offsets = [12, 40], sizes = [2, 8], strides = [1, 1]} : vector<16x64xf32> to vector<2x8xf32>
    %80 = arith.addf %78, %79 : vector<2x8xf32>
    %81 = vector.extract_strided_slice %67 {offsets = [14, 56], sizes = [2, 8], strides = [1, 1]} : vector<16x64xf32> to vector<2x8xf32>
    %82 = arith.addf %80, %81 : vector<2x8xf32>
    %c0_64 = arith.constant 0 : index
    %c0_65 = arith.constant 0 : index
    %83 = vector.load %arg9[%c0_64, %c0_65] : memref<1x8xf32, #tpu.memory_space<vmem>>, vector<1x8xf32>
    %84 = vector.broadcast %83 : vector<1x8xf32> to vector<2x8xf32>
    %85 = arith.addf %82, %84 : vector<2x8xf32>
    %86 = vector.extract_strided_slice %85 {offsets = [0, 0], sizes = [2, 6], strides = [1, 1]} : vector<2x8xf32> to vector<2x6xf32>
    %c0_66 = arith.constant 0 : index
    %c0_67 = arith.constant 0 : index
    %87 = vector.load %arg11[%c0_66, %c0_67] : memref<2x6xf32, #tpu.memory_space<vmem>>, vector<2x6xf32>
    tpu.vector_store %arg11[%c0_66, %c0_67], %86 {strides = array<i32>} : memref<2x6xf32, #tpu.memory_space<vmem>>, vector<2x6xf32>,
    return
  }
  func.func @transform_0(%arg0: i32) -> (i32, i32) {
    %c0_i32 = arith.constant 0 : i32
    %c0_i32_0 = arith.constant 0 : i32
    %c0_i32_1 = arith.constant 0 : i32
    return %c0_i32, %c0_i32_0 : i32, i32
  }
  func.func @transform_1(%arg0: i32) -> (i32, i32) {
    %c0_i32 = arith.constant 0 : i32
    %c0_i32_0 = arith.constant 0 : i32
    %c0_i32_1 = arith.constant 0 : i32
    return %c0_i32, %c0_i32_0 : i32, i32
  }
  func.func @transform_2(%arg0: i32) -> (i32, i32) {
    %c0_i32 = arith.constant 0 : i32
    %c0_i32_0 = arith.constant 0 : i32
    %c0_i32_1 = arith.constant 0 : i32
    return %c0_i32, %c0_i32_0 : i32, i32
  }
  func.func @transform_3(%arg0: i32) -> (i32, i32, i32) {
    %c0_i32 = arith.constant 0 : i32
    %c0_i32_0 = arith.constant 0 : i32
    %c0_i32_1 = arith.constant 0 : i32
    %c0_i32_2 = arith.constant 0 : i32
    return %c0_i32, %c0_i32_0, %c0_i32_1 : i32, i32, i32
  }
  func.func @transform_4(%arg0: i32) -> (i32, i32) {
    %c0_i32 = arith.constant 0 : i32
    %c0_i32_0 = arith.constant 0 : i32
    %c0_i32_1 = arith.constant 0 : i32
    return %c0_i32, %c0_i32_0 : i32, i32
  }
  func.func @transform_5(%arg0: i32) -> (i32, i32, i32) {
    %c0_i32 = arith.constant 0 : i32
    %c0_i32_0 = arith.constant 0 : i32
    %c0_i32_1 = arith.constant 0 : i32
    %c0_i32_2 = arith.constant 0 : i32
    return %c0_i32, %c0_i32_0, %c0_i32_1 : i32, i32, i32
  }
  func.func @transform_6(%arg0: i32) -> (i32, i32) {
    %c0_i32 = arith.constant 0 : i32
    %c0_i32_0 = arith.constant 0 : i32
    %c0_i32_1 = arith.constant 0 : i32
    return %c0_i32, %c0_i32_0 : i32, i32
  }
  func.func @transform_7(%arg0: i32) -> (i32, i32) {
    %c0_i32 = arith.constant 0 : i32
    %c0_i32_0 = arith.constant 0 : i32
    %c0_i32_1 = arith.constant 0 : i32
    return %c0_i32, %c0_i32_0 : i32, i32
  }
  func.func @transform_8(%arg0: i32) -> (i32, i32) {
    %c0_i32 = arith.constant 0 : i32
    %c0_i32_0 = arith.constant 0 : i32
    %c0_i32_1 = arith.constant 0 : i32
    return %c0_i32, %c0_i32_0 : i32, i32
  }
  func.func @transform_9(%arg0: i32) -> (i32, i32) {
    %c0_i32 = arith.constant 0 : i32
    %c0_i32_0 = arith.constant 0 : i32
    %c0_i32_1 = arith.constant 0 : i32
    return %c0_i32, %c0_i32_0 : i32, i32
  }
  func.func @transform_10(%arg0: i32) -> (i32, i32) {
    %c0_i32 = arith.constant 0 : i32
    %c0_i32_0 = arith.constant 0 : i32
    %c0_i32_1 = arith.constant 0 : i32
    return %c0_i32, %c0_i32_0 : i32, i32
  }
}

</mosaic_0001>

<bundles_post_ra>
// kernel: har_cnn_forward.1
= control target key start
LH: loop header
LB: loop body
LE: loop exit
PB: predicated region body
PF: predicated region fallthrough
CT: control target
= control target key end

     0   :  { %vm52_vm0 = vcmask 64512   ;;  %s2097_s0 = inlined_call_operand.vmem [shape: f32[64,8], index: 0, kind: input, shape index: {}]   ;;  %s2098_s1 = inlined_call_operand.vmem [shape: f32[8,64], index: 1, kind: input, shape index: {}]   ;;  %s2099_s2 = inlined_call_operand.vmem [shape: f32[1,64], index: 2, kind: input, shape index: {}]   ;;  %s2100_s3 = inlined_call_operand.vmem [shape: bf16[3,64,128], index: 3, kind: input, shape index: {}]   ;;  %s2101_s4 = inlined_call_operand.vmem [shape: f32[1,128], index: 4, kind: input, shape index: {}]   ;;  %s2102_s5 = inlined_call_operand.vmem [shape: bf16[3,128,256], index: 5, kind: input, shape index: {}]   ;;  %s2103_s6 = inlined_call_operand.vmem [shape: f32[1,256], index: 6, kind: input, shape index: {}]   ;;  %s2104_s7 = inlined_call_operand.vmem [shape: bf16[256,64], index: 7, kind: input, shape index: {}]   ;;  %s2105_s8 = inlined_call_operand.vmem [shape: f32[1,8], index: 8, kind: input, shape index: {}]   ;;  %s2106_s9 = inlined_call_operand.vmem [shape: f32[16,256], index: 9, kind: output, shape index: {0}]   ;;  %s2107_s10 = inlined_call_operand.hbm [shape: f32[2,6], index: 10, kind: output, shape index: {1}]  }
   0x1   :  { %v44_v0 = vld [vmem:[%s2098_s1] sm:$0xff]  ;;  %v37_v2 = vld [vmem:[%s2097_s0 + $0x8] sm:$0xff]  ;;  %v38_v3 = vld [vmem:[%s2097_s0 + $0x10] sm:$0xff] }
   0x2   :  { %v36_v1 = vld [vmem:[%s2097_s0] sm:$0xff]  ;;  %1502 = vmatprep.subr.mxu1 %v44_v0  ;;  %v39_v4 = vld [vmem:[%s2097_s0 + $0x18] sm:$0xff]  ;;  %v41_v6 = vld [vmem:[%s2097_s0 + $0x28] sm:$0xff] }
   0x3   :  { %1504 = vmatprep.mubr.msk.f32.mxu1 %vm52_vm0, %v36_v1  ;;  %1503 = vmatpush3.msra.mxu1 %v44_v0  ;;  %v40_v5 = vld [vmem:[%s2097_s0 + $0x20] sm:$0xff]  ;;  %v42_v7 = vld [vmem:[%s2097_s0 + $0x30] sm:$0xff]  ;;  %v43_v8 = vld [vmem:[%s2097_s0 + $0x38] sm:$0xff] }
   0x4   :  { %1505 = vmatmul.mubr.msk.f32.vlgmr.msra.gmra.mrb[0].mxu1 %vm52_vm0, %v37_v2 }
   0x5   :  { %1507 = vmatprep.mubr.msk.f32.mxu1 %vm52_vm0, %v38_v3 }
   0x8   :  { %1508 = vmatmul.mubr.msk.f32.gmra.mrb[2].mxu1 %vm52_vm0, %v39_v4 }
   0x9   :  { %1510 = vmatprep.mubr.msk.f32.mxu1 %vm52_vm0, %v40_v5 }
   0xc   :  { %1511 = vmatmul.mubr.msk.f32.gmra.mrb[4].mxu1 %vm52_vm0, %v41_v6 }
   0xd   :  { %1513 = vmatprep.mubr.msk.f32.mxu1 %vm52_vm0, %v42_v7 }
  0x10   :  { %1514 = vmatmul.mubr.msk.f32.gmra.mrb[6].mxu1 %vm52_vm0, %v43_v8 }
  0x11   :  { %16 = vsyncpa [#allocation5], 0  ;;  %v1577_v9 = vld [vmem:[%s2100_s3 + $0x20] sm:$0xff]   ;;  %v1578_v10 = vld [vmem:[%s2100_s3 + $0x28] sm:$0xff]   ;;  %vm208_vm1 = vcmask 519168   ;;  %v1710_v14 = vmov 0  }
  0x12   :  { %1516 = vmatprep.subr.bf16.mxu1 %v1577_v9  ;;  %v1579_v11 = vld [vmem:[%s2100_s3 + $0x30] sm:$0xff]   ;;  %v1580_v12 = vld [vmem:[%s2100_s3 + $0x38] sm:$0xff]   ;;  %v1824_v13 = vld [vmem:[%s2100_s3] sm:$0xff]   ;;  %231 = vst.msk [vmem:[#allocation2 + $0x10] sm:$0xf] %vm208_vm1, %v1710_v14  ;;  %727 = vmatprep.mubr.bf16.mxu0 %v1710_v14  ;;  %vm291_vm2 = vcmask 523264  }
  0x13   :  { %1517 = vmatpush3.bf16.msra.mxu1 %v1577_v9  ;;  %571 = vst [vmem:[#allocation3 + $0x8] sm:$0xf] %v1710_v14  ;;  %v1595_v15 = vld [vmem:[%s2102_s5 + $0x84] ss:$8 sps:$4 sm:$0xff]   ;;  %v1597_v16 = vld [vmem:[%s2102_s5 + $0x80] ss:$8 sps:$4 sm:$0xff]  }
  0x14   :  { %1518 = vmatprep.subr.bf16.mxu1 %v1578_v10  ;;  %v1598_v17 = vld [vmem:[%s2102_s5 + $0x94] ss:$8 sps:$4 sm:$0xff]   ;;  %695 = vmatprep.subr.bf16.mxu0 %v1595_v15  ;;  %v1600_v18 = vld [vmem:[%s2102_s5 + $0x90] ss:$8 sps:$4 sm:$0xff]   ;;  %v1601_v19 = vld [vmem:[%s2102_s5 + $0xa4] ss:$8 sps:$4 sm:$0xff]  }
  0x15   :  { %696 = vmatpush1.bf16.msra.mxu0 %v1597_v16  ;;  %v1603_v20 = vld [vmem:[%s2102_s5 + $0xa0] ss:$8 sps:$4 sm:$0xff]   ;;  %v1604_v21 = vld [vmem:[%s2102_s5 + $0xb4] ss:$8 sps:$4 sm:$0xff]   ;;  %v1606_v22 = vld [vmem:[%s2102_s5 + $0xb0] ss:$8 sps:$4 sm:$0xff]  }
  0x16   :  { %697 = vmatprep.subr.bf16.mxu0 %v1598_v17  ;;  %v1278_v23 = vld [vmem:[%s2099_s2] ss:$0 sm:$0xff]  ;;  %v1584_v58 = vld [vmem:[%s2100_s3 + $0x8] sm:$0xff]   ;;  %v1585_v59 = vld [vmem:[%s2100_s3 + $0x10] sm:$0xff]   ;;  %s1711_s24 = smov 80   ;;  %s1712_s25 = smov 112  }
  0x17   :  { %1519 = vmatpush3.bf16.msra.mxu1 %v1578_v10  ;;  %v1586_v61 = vld [vmem:[%s2100_s3 + $0x18] sm:$0xff]   ;;  %v1589_v62 = vld [vmem:[%s2100_s3 + $0x40] sm:$0xff]   ;;  %v1591_v0 = vld [vmem:[%s2100_s3 + $0x48] sm:$0xff]   ;;  %s1713_s26 = smov 120   ;;  %s1714_s27 = smov 96   ;;  %vm1258_vm3 = vcmask 41984  }
  0x18   :  { %1520 = vmatprep.subr.bf16.mxu1 %v1579_v11  ;;  %v1592_v2 = vld [vmem:[%s2100_s3 + $0x50] sm:$0xff]   ;;  %v1593_v3 = vld [vmem:[%s2100_s3 + $0x58] sm:$0xff]   ;;  %v1607_v5 = vld [vmem:[%s2102_s5 + $0xc4] ss:$8 sps:$4 sm:$0xff]   ;;  %s1716_s28 = smov 104   ;;  %s1717_s29 = smov 72  }
  0x19   :  { %698 = vmatpush1.bf16.msra.mxu0 %v1600_v18  ;;  %v1609_v6 = vld [vmem:[%s2102_s5 + $0xc0] ss:$8 sps:$4 sm:$0xff]   ;;  %v1610_v7 = vld [vmem:[%s2102_s5 + $0xd4] ss:$8 sps:$4 sm:$0xff]   ;;  %v1612_v8 = vld [vmem:[%s2102_s5 + $0xd0] ss:$8 sps:$4 sm:$0xff]  }
  0x1a   :  { %699 = vmatprep.subr.bf16.mxu0 %v1601_v19  ;;  %v1613_v9 = vld [vmem:[%s2102_s5 + $0xe4] ss:$8 sps:$4 sm:$0xff]   ;;  %v1615_v10 = vld [vmem:[%s2102_s5 + $0xe0] ss:$8 sps:$4 sm:$0xff]   ;;  %v1674_v19 = vld [vmem:[%s2104_s7 + $0x50] sm:$0xff]   ;;  %s1718_s12 = smov [#allocation4]  }
  0x1b   :  { %1521 = vmatpush3.bf16.msra.mxu1 %v1579_v11  ;;  %v1616_v11 = vld [vmem:[%s2102_s5 + $0xf4] ss:$8 sps:$4 sm:$0xff]   ;;  %v1670_v15 = vld [vmem:[%s2104_s7 + $0x40] sm:$0xff]   ;;  %v1672_v17 = vld [vmem:[%s2104_s7 + $0x48] sm:$0xff]   ;;  %s1268_s3 = sshll.u32 %s1718_s12, 4  ;;  %s1269_s3 = int_to_ptr.vmem [resolvable:$true] %s1268_s3 }
  0x1c   :  { %1522 = vmatprep.subr.bf16.mxu1 %v1580_v12  ;;  %v1671_v16 = vld [vmem:[%s2104_s7] sm:$0xff]   ;;  %v1673_v18 = vld [vmem:[%s2104_s7 + $0x8] sm:$0xff]   ;;  %s1686_s13 = scalar_lea.vmem %s1269_s3, 32  ;;  %p1691_p1 = scmp.lt.s32.totalorder %s1269_s3, %s1269_s3 }
  0x1d   :  { %700 = vmatpush1.bf16.msra.mxu0 %v1603_v20  ;;  %v1675_v20 = vld [vmem:[%s2104_s7 + $0x10] sm:$0xff]   ;;  %p1687_p0 = scmp.ne.s32.totalorder %s1269_s3, %s1686_s13  ;;  %p1692_p2 = scmp.lt.s32.totalorder %s1686_s13, %s1686_s13 }
  0x1e   :  { %701 = vmatprep.subr.bf16.mxu0 %v1604_v21  ;;  %v1676_v21 = vld [vmem:[%s2104_s7 + $0x58] sm:$0xff]  }
  0x1f   :  { %1523 = vmatpush3.bf16.msra.mxu1 %v1580_v12  ;;  %v1618_v12 = vld [vmem:[%s2102_s5 + $0xf0] ss:$8 sps:$4 sm:$0xff]   ;;  %p1693_p3 = por %p1692_p2, %p1691_p1 }
  0x20   :  { %1528 = vmatprep.subr.bf16.mxu1 %v1824_v13 }
  0x21   :  { %702 = vmatpush1.bf16.msra.mxu0 %v1606_v22  ;;  %v1677_v22 = vld [vmem:[%s2104_s7 + $0x18] sm:$0xff]   ;;  %p1694_p4 = pnand %p1693_p3, %p1687_p0 }
  0x22   :  { %703 = vmatprep.subr.bf16.mxu0 %v1607_v5  ;;  %v1660_v5 = vld [vmem:[%s2102_s5 + $0x150] ss:$8 sps:$4 sm:$0xff]  }
  0x25   :  { %704 = vmatpush1.bf16.msra.mxu0 %v1609_v6  ;;  %v1665_v6 = vld [vmem:[%s2102_s5 + $0x164] ss:$8 sps:$4 sm:$0xff]  }
  0x26   :  { %705 = vmatprep.subr.bf16.mxu0 %v1610_v7  ;;  %v1663_v7 = vld [vmem:[%s2102_s5 + $0x160] ss:$8 sps:$4 sm:$0xff]  }
  0x29   :  { %706 = vmatpush1.bf16.msra.mxu0 %v1612_v8  ;;  %v1668_v8 = vld [vmem:[%s2102_s5 + $0x174] ss:$8 sps:$4 sm:$0xff]  }
  0x2a   :  { %707 = vmatprep.subr.bf16.mxu0 %v1613_v9  ;;  %v1666_v9 = vld [vmem:[%s2102_s5 + $0x170] ss:$8 sps:$4 sm:$0xff]  }
  0x2d   :  { %708 = vmatpush1.bf16.msra.mxu0 %v1615_v10 }
  0x2e   :  { %709 = vmatprep.subr.bf16.mxu0 %v1616_v11  ;;  %v1681_v11 = vld [vmem:[%s2104_s7 + $0x28] sm:$0xff]  }
  0x31   :  { %710 = vmatpush1.bf16.msra.mxu0 %v1618_v12  ;;  %v1682_v12 = vld [vmem:[%s2104_s7 + $0x70] sm:$0xff]  }
  0xd7   :  { %v1506_v24 = vpop.f32.mrb[0].mxu1 }
  0xd8   :  { %v149_v25 = vadd.f32 %v1506_v24, %v1278_v23  ;;  %v143_v26 = vpop.f32.mrb[1].mxu1  ;;  %v1679_v24 = vld [vmem:[%s2104_s7 + $0x20] sm:$0xff]  }
  0xd9   :  { %v144_v27 = vadd.f32 %v1278_v23, %v143_v26  ;;  %v1335_v26 = vld [vmem:[%s2101_s4] ss:$0 sm:$0xff] }
  0xda   :  { %v183_v28 = vmax.f32 %v149_v25, 0.0  ;;  %v1680_v25 = vld [vmem:[%s2104_s7 + $0x68] sm:$0xff]  }
  0xdb   :  { %v182_v29 = vmax.f32 %v144_v27, 0.0  ;;  %v1509_v30 = vpop.f32.mrb[2].mxu1 }
  0xdc   :  { %v1439_v31 = vpack.c.bf16 %v183_v28, %v183_v28  ;;  %v159_v32 = vadd.f32 %v1509_v30, %v1278_v23  ;;  %v153_v33 = vpop.f32.mrb[3].mxu1 }
  0xdd   :  { %v1438_v34 = vpack.c.bf16 %v182_v29, %v182_v29  ;;  %v154_v35 = vadd.f32 %v1278_v23, %v153_v33 }
  0xde   :  { %210 = vst.msk [vmem:[#allocation2 + $0x4] sm:$0xf] %vm208_vm1, %v1439_v31  ;;  %v185_v36 = vmax.f32 %v159_v32, 0.0 }
  0xdf   :  { %209 = vst.msk [vmem:[#allocation2] sm:$0xf] %vm208_vm1, %v1438_v34  ;;  %v184_v37 = vmax.f32 %v154_v35, 0.0  ;;  %v1512_v38 = vpop.f32.mrb[4].mxu1 }
  0xe0   :  { %v1441_v39 = vpack.c.bf16 %v185_v36, %v185_v36  ;;  %v169_v40 = vadd.f32 %v1512_v38, %v1278_v23  ;;  %v163_v41 = vpop.f32.mrb[5].mxu1 }
  0xe1   :  { %v1440_v42 = vpack.c.bf16 %v184_v37, %v184_v37  ;;  %v164_v43 = vadd.f32 %v1278_v23, %v163_v41 }
  0xe2   :  { %212 = vst.msk [vmem:[#allocation2 + $0xc] sm:$0xf] %vm208_vm1, %v1441_v39  ;;  %v187_v44 = vmax.f32 %v169_v40, 0.0 }
  0xe3   :  { %211 = vst.msk [vmem:[#allocation2 + $0x8] sm:$0xf] %vm208_vm1, %v1440_v42  ;;  %v186_v45 = vmax.f32 %v164_v43, 0.0  ;;  %v1515_v46 = vpop.f32.mrb[6].mxu1  ;;  %v1619_v42 = vld [vmem:[%s2102_s5] ss:$8 sps:$4 sm:$0xff]  }
  0xe4   :  { %v1443_v47 = vpack.c.bf16 %v187_v44, %v187_v44  ;;  %v179_v48 = vadd.f32 %v1515_v46, %v1278_v23  ;;  %v173_v49 = vpop.f32.mrb[7].mxu1  ;;  %v1625_v43 = vld [vmem:[%s2102_s5 + $0x14] ss:$8 sps:$4 sm:$0xff]   ;;  %v1628_v46 = vld [vmem:[%s2102_s5 + $0x24] ss:$8 sps:$4 sm:$0xff]  }
  0xe5   :  { %v1442_v50 = vpack.c.bf16 %v186_v45, %v186_v45  ;;  %v174_v51 = vadd.f32 %v1278_v23, %v173_v49  ;;  %v1678_v23 = vld [vmem:[%s2104_s7 + $0x60] sm:$0xff]   ;;  %v1623_v45 = vld [vmem:[%s2102_s5 + $0x10] ss:$8 sps:$4 sm:$0xff]  }
  0xe6   :  { %228 = vst.msk [vmem:[#allocation2 + $0x18] sm:$0xf] %vm208_vm1, %v1443_v47  ;;  %v189_v52 = vmax.f32 %v179_v48, 0.0  ;;  %v1581_v53 = vld [vmem:[#allocation2] sm:$0xff]   ;;  %v1631_v48 = vld [vmem:[%s2102_s5 + $0x34] ss:$8 sps:$4 sm:$0xff]  }
  0xe7   :  { %227 = vst.msk [vmem:[#allocation2 + $0x14] sm:$0xf] %vm208_vm1, %v1442_v50  ;;  %v188_v54 = vmax.f32 %v174_v51, 0.0  ;;  %1524 = vmatprep.mubr.msk.bf16.mxu1 %vm291_vm2, %v1581_v53  ;;  %v1626_v47 = vld [vmem:[%s2102_s5 + $0x20] ss:$8 sps:$4 sm:$0xff]  }
  0xe8   :  { %v1445_v55 = vpack.c.bf16 %v189_v52, %v189_v52  ;;  %v1629_v49 = vld [vmem:[%s2102_s5 + $0x30] ss:$8 sps:$4 sm:$0xff]   ;;  %v1634_v50 = vld [vmem:[%s2102_s5 + $0x44] ss:$8 sps:$4 sm:$0xff]   ;;  %v1632_v51 = vld [vmem:[%s2102_s5 + $0x40] ss:$8 sps:$4 sm:$0xff]  }
  0xe9   :  { %v1444_v56 = vpack.c.bf16 %v188_v54, %v188_v54  ;;  %v1637_v52 = vld [vmem:[%s2102_s5 + $0x54] ss:$8 sps:$4 sm:$0xff]   ;;  %v1635_v53 = vld [vmem:[%s2102_s5 + $0x50] ss:$8 sps:$4 sm:$0xff]   ;;  %v1640_v54 = vld [vmem:[%s2102_s5 + $0x64] ss:$8 sps:$4 sm:$0xff]  }
  0xea   :  { %230 = vst.msk [vmem:[#allocation2 + $0x20] sm:$0xf] %vm208_vm1, %v1445_v55  ;;  %v1583_v57 = vld [vmem:[#allocation2 + $0x8] sm:$0xff]  }
  0xeb   :  { %229 = vst.msk [vmem:[#allocation2 + $0x1c] sm:$0xf] %vm208_vm1, %v1444_v56  ;;  %1525 = vmatmul.mubr.msk.bf16.vlgmr.msra.gmra.mrb[8].mxu1 %vm291_vm2, %v1583_v57  ;;  %v1638_v55 = vld [vmem:[%s2102_s5 + $0x60] ss:$8 sps:$4 sm:$0xff]   ;;  %v1643_v56 = vld [vmem:[%s2102_s5 + $0x74] ss:$8 sps:$4 sm:$0xff]  }
  0xec   :  { %1529 = vmatpush3.bf16.msra.mxu1 %v1824_v13  ;;  %v1621_v13 = vld [vmem:[%s2102_s5 + $0x4] ss:$8 sps:$4 sm:$0xff]   ;;  %v1641_v57 = vld [vmem:[%s2102_s5 + $0x70] ss:$8 sps:$4 sm:$0xff]  }
  0xed   :  { %1530 = vmatprep.subr.bf16.mxu1 %v1584_v58  ;;  %824 = vmatprep.subr.bf16.mxu0 %v1621_v13  ;;  %v1683_v13 = vld [vmem:[%s2104_s7 + $0x30] sm:$0xff]  }
  0xee   :  { %v1587_v60 = vld [vmem:[#allocation2 + $0x10] sm:$0xff]  }
  0xef   :  { %1536 = vmatprep.mubr.msk.bf16.mxu1 %vm291_vm2, %v1587_v60  ;;  %v1590_v1 = vld [vmem:[#allocation2 + $0x14] sm:$0xff]  }
  0xf0   :  { %1531 = vmatpush3.bf16.msra.mxu1 %v1584_v58  ;;  %v1647_v58 = vld [vmem:[%s2102_s5 + $0x104] ss:$8 sps:$4 sm:$0xff]  }
  0xf1   :  { %1532 = vmatprep.subr.bf16.mxu1 %v1585_v59 }
  0xf2   :  { %v1588_v63 = vld [vmem:[#allocation2 + $0x18] sm:$0xff]  }
  0xf3   :  { %v1594_v4 = vld [vmem:[#allocation2 + $0x1c] sm:$0xff]  }
  0xf4   :  { %1533 = vmatpush3.bf16.msra.mxu1 %v1585_v59  ;;  %v1645_v59 = vld [vmem:[%s2102_s5 + $0x100] ss:$8 sps:$4 sm:$0xff]  }
  0xf5   :  { %1534 = vmatprep.subr.bf16.mxu1 %v1586_v61 }
  0xf8   :  { %1535 = vmatpush3.bf16.msra.mxu1 %v1586_v61  ;;  %v1650_v61 = vld [vmem:[%s2102_s5 + $0x114] ss:$8 sps:$4 sm:$0xff]  }
  0xf9   :  { %1540 = vmatprep.subr.bf16.mxu1 %v1589_v62 }
  0xfb   :  { %1537 = vmatmul.mubr.msk.bf16.vlgmr.msra.gmra.mrb[8].mxu1 %vm291_vm2, %v1588_v63  ;;  %v1653_v63 = vld [vmem:[%s2102_s5 + $0x124] ss:$8 sps:$4 sm:$0xff]  }
  0xfc   :  { %1541 = vmatpush3.bf16.msra.mxu1 %v1589_v62  ;;  %1548 = vmatprep.mubr.msk.bf16.mxu1 %vm291_vm2, %v1590_v1  ;;  %v1648_v62 = vld [vmem:[%s2102_s5 + $0x110] ss:$8 sps:$4 sm:$0xff]   ;;  %v1656_v1 = vld [vmem:[%s2102_s5 + $0x134] ss:$8 sps:$4 sm:$0xff]  }
  0xfd   :  { %1542 = vmatprep.subr.bf16.mxu1 %v1591_v0 }
 0x100   :  { %1543 = vmatpush3.bf16.msra.mxu1 %v1591_v0  ;;  %v1651_v0 = vld [vmem:[%s2102_s5 + $0x120] ss:$8 sps:$4 sm:$0xff]  }
 0x101   :  { %1544 = vmatprep.subr.bf16.mxu1 %v1592_v2 }
 0x104   :  { %1545 = vmatpush3.bf16.msra.mxu1 %v1592_v2  ;;  %v1659_v2 = vld [vmem:[%s2102_s5 + $0x144] ss:$8 sps:$4 sm:$0xff]  }
 0x105   :  { %1546 = vmatprep.subr.bf16.mxu1 %v1593_v3 }
 0x108   :  { %1547 = vmatpush3.bf16.msra.mxu1 %v1593_v3  ;;  %v1657_v3 = vld [vmem:[%s2102_s5 + $0x140] ss:$8 sps:$4 sm:$0xff]  }
 0x109   :  { %1480 = vmatprep.subr.bf16.mxu1 %v1670_v15  ;;  %v1684_v15 = vld [vmem:[%s2104_s7 + $0x78] sm:$0xff]  }
 0x10b   :  { %1549 = vmatmul.mubr.msk.bf16.vlgmr.msra.gmra.mrb[8].mxu1 %vm291_vm2, %v1594_v4  ;;  %v1662_v4 = vld [vmem:[%s2102_s5 + $0x154] ss:$8 sps:$4 sm:$0xff]  }
 0x10c   :  { %1481 = vmatpush3.bf16.msra.mxu1 %v1671_v16  ;;  %v1685_v16 = vld [vmem:[%s2104_s7 + $0x38] sm:$0xff]  }
 0x10d   :  { %1482 = vmatprep.subr.bf16.mxu1 %v1672_v17  ;;  %v1021_v17 = vlaneseq }
 0x110   :  { %1483 = vmatpush3.bf16.msra.mxu1 %v1673_v18  ;;  %v1022_v18 = vshrl.u32 %v1021_v17, 7 }
 0x111   :  { %1484 = vmatprep.subr.bf16.mxu1 %v1674_v19 }
 0x112   :  { %v1023_v19 = vsub.s32 0, %v1022_v18 }
 0x114   :  { %1485 = vmatpush3.bf16.msra.mxu1 %v1675_v20  ;;  %v1019_v20 = vld [vmem:[%s2103_s6] sm:$0x3] }
 0x115   :  { %1486 = vmatprep.subr.bf16.mxu1 %v1676_v21  ;;  %v1027_v21 = vsub.s32 1, %v1022_v18 }
 0x118   :  { %1487 = vmatpush3.bf16.msra.mxu1 %v1677_v22  ;;  %v1024_v22 = vrot.slane %v1019_v20, %v1023_v19 }
 0x119   :  { %1488 = vmatprep.subr.bf16.mxu1 %v1678_v23  ;;  %v1028_v23 = vrot.slane %v1019_v20, %v1027_v21 }
 0x11c   :  { %1489 = vmatpush3.bf16.msra.mxu1 %v1679_v24 }
 0x11d   :  { %1490 = vmatprep.subr.bf16.mxu1 %v1680_v25 }
 0x120   :  { %1491 = vmatpush3.bf16.msra.mxu1 %v1681_v11 }
 0x121   :  { %1492 = vmatprep.subr.bf16.mxu1 %v1682_v12 }
 0x124   :  { %1493 = vmatpush3.bf16.msra.mxu1 %v1683_v13 }
 0x125   :  { %1494 = vmatprep.subr.bf16.mxu1 %v1684_v15 }
 0x128   :  { %1495 = vmatpush3.bf16.msra.mxu1 %v1685_v16 }
 0x1de   :  { %v1550_v27 = vpop.f32.mrb[8].mxu1 }
 0x1df   :  { %v551_v28 = vadd.f32 %v1550_v27, %v1335_v26  ;;  %v523_v29 = vpop.f32.mrb[9].mxu1 }
 0x1e0   :  { %v549_v30 = vadd.f32 %v1335_v26, %v523_v29  ;;  %v1551_v31 = vpop.f32.mrb[10].mxu1 }
 0x1e1   :  { %v555_v32 = vmax.f32 %v551_v28, 0.0  ;;  %v552_v33 = vadd.f32 %v1551_v31, %v1335_v26  ;;  %v526_v34 = vpop.f32.mrb[11].mxu1 }
 0x1e2   :  { %v553_v35 = vmax.f32 %v549_v30, 0.0  ;;  %v550_v36 = vadd.f32 %v1335_v26, %v526_v34 }
 0x1e3   :  { %v556_v37 = vmax.f32 %v552_v33, 0.0 }
 0x1e4   :  { %v1451_v38 = vpack.c.bf16 %v555_v32, %v553_v35  ;;  %v554_v39 = vmax.f32 %v550_v36, 0.0 }
 0x1e5   :  { %v1447_v40 = vpack.c.bf16 %v556_v37, %v556_v37 }
 0x1e6   :  { %1452 = vst [vmem:[#allocation3] sm:$0xff] %v1451_v38   ;;  %v1446_v41 = vpack.c.bf16 %v554_v39, %v554_v39 }
 0x1e7   :  { %570 = vst [vmem:[#allocation3 + $0x10] sm:$0xf] %v1447_v40 }
 0x1e8   :  { %564 = vst [vmem:[#allocation3 + $0xc] sm:$0xf] %v1446_v41 }
 0x1ed   :  { %v1622_v44 = vld [vmem:[#allocation3] sm:$0xff]  }
 0x1ee   :  { %728 = vmatmul.mubr.bf16.vlgmr.msra.gmra.mrb[0].mxu0 %v1622_v44 }
 0x1ef   :  { %825 = vmatpush1.bf16.msra.mxu0 %v1619_v42  ;;  %856 = vmatprep.mubr.bf16.mxu0 %v1710_v14  ;;  %v1644_v60 = vld [vmem:[#allocation3 + $0x8] sm:$0xff]  }
 0x1f0   :  { %826 = vmatprep.subr.bf16.mxu0 %v1625_v43  ;;  %v1669_v10 = vld [vmem:[#allocation3 + $0xc] sm:$0xff]  }
 0x1f3   :  { %827 = vmatpush1.bf16.msra.mxu0 %v1623_v45 }
 0x1f4   :  { %828 = vmatprep.subr.bf16.mxu0 %v1628_v46 }
 0x1f7   :  { %829 = vmatpush1.bf16.msra.mxu0 %v1626_v47 }
 0x1f8   :  { %830 = vmatprep.subr.bf16.mxu0 %v1631_v48 }
 0x1fb   :  { %831 = vmatpush1.bf16.msra.mxu0 %v1629_v49 }
 0x1fc   :  { %832 = vmatprep.subr.bf16.mxu0 %v1634_v50 }
 0x1ff   :  { %833 = vmatpush1.bf16.msra.mxu0 %v1632_v51 }
 0x200   :  { %834 = vmatprep.subr.bf16.mxu0 %v1637_v52 }
 0x203   :  { %835 = vmatpush1.bf16.msra.mxu0 %v1635_v53 }
 0x204   :  { %836 = vmatprep.subr.bf16.mxu0 %v1640_v54 }
 0x207   :  { %837 = vmatpush1.bf16.msra.mxu0 %v1638_v55 }
 0x208   :  { %838 = vmatprep.subr.bf16.mxu0 %v1643_v56 }
 0x20b   :  { %839 = vmatpush1.bf16.msra.mxu0 %v1641_v57 }
 0x20c   :  { %972 = vmatprep.subr.bf16.mxu0 %v1647_v58 }
 0x20e   :  { %857 = vmatmul.mubr.bf16.vlgmr.msra.gmra.mrb[0].mxu0 %v1644_v60 }
 0x20f   :  { %973 = vmatpush1.bf16.msra.mxu0 %v1645_v59  ;;  %1004 = vmatprep.mubr.bf16.mxu0 %v1710_v14  ;;  %v1654_v14 = vld [vmem:[%s2102_s5 + $0x130] ss:$8 sps:$4 sm:$0xff]  }
 0x210   :  { %974 = vmatprep.subr.bf16.mxu0 %v1650_v61 }
 0x213   :  { %975 = vmatpush1.bf16.msra.mxu0 %v1648_v62  ;;  %v1437_v62 = vld [vmem:[%s2105_s8] ss:$0 sm:$0xff] }
 0x214   :  { %976 = vmatprep.subr.bf16.mxu0 %v1653_v63 }
 0x217   :  { %977 = vmatpush1.bf16.msra.mxu0 %v1651_v0 }
 0x218   :  { %978 = vmatprep.subr.bf16.mxu0 %v1656_v1 }
 0x21b   :  { %979 = vmatpush1.bf16.msra.mxu0 %v1654_v14 }
 0x21c   :  { %980 = vmatprep.subr.bf16.mxu0 %v1659_v2 }
 0x21f   :  { %981 = vmatpush1.bf16.msra.mxu0 %v1657_v3 }
 0x220   :  { %982 = vmatprep.subr.bf16.mxu0 %v1662_v4 }
 0x223   :  { %983 = vmatpush1.bf16.msra.mxu0 %v1660_v5 }
 0x224   :  { %984 = vmatprep.subr.bf16.mxu0 %v1665_v6 }
 0x227   :  { %985 = vmatpush1.bf16.msra.mxu0 %v1663_v7 }
 0x228   :  { %986 = vmatprep.subr.bf16.mxu0 %v1668_v8 }
 0x22b   :  { %987 = vmatpush1.bf16.msra.mxu0 %v1666_v9 }
 0x22e   :  { %1005 = vmatmul.mubr.bf16.vlgmr.msra.gmra.mrb[0].mxu0 %v1669_v10 }
 0x301   :  { %v1006_v24 = vpop.f32.mrb[0].mxu0 }
 0x302   :  { %v1031_v25 = vadd.f32 %v1024_v22, %v1006_v24  ;;  %v1008_v26 = vpop.f32.mrb[1].mxu0 }
 0x303   :  { %v1032_v27 = vadd.f32 %v1028_v23, %v1008_v26  ;;  %v1010_v28 = vpop.f32.mrb[2].mxu0 }
 0x304   :  { %v1035_v29 = vmax.f32 %v1031_v25, 0.0  ;;  %v1033_v30 = vadd.f32 %v1024_v22, %v1010_v28  ;;  %v1012_v31 = vpop.f32.mrb[3].mxu0 }
 0x305   :  { %v1036_v32 = vmax.f32 %v1032_v27, 0.0  ;;  %v1034_v33 = vadd.f32 %v1028_v23, %v1012_v31 }
 0x306   :  { %1039 = vst [vmem:[%s2106_s9] sm:$0xff] %v1035_v29  ;;  %v1037_v34 = vmax.f32 %v1033_v30, 0.0 }
 0x307   :  { %1040 = vst [vmem:[%s2106_s9 + $0x8] sm:$0xff] %v1036_v32  ;;  %v1038_v35 = vmax.f32 %v1034_v33, 0.0 }
 0x308   :  { %1041 = vst [vmem:[%s2106_s9 + $0x10] sm:$0xff] %v1037_v34  ;;  %v1043_v36 = vpack.c.bf16 %v1037_v34, %v1035_v29 }
 0x309   :  { %1042 = vst [vmem:[%s2106_s9 + $0x18] sm:$0xff] %v1038_v35  ;;  %v1044_v37 = vpack.c.bf16 %v1038_v35, %v1036_v32  ;;  %s1715_s9 = smov 88  }
 0x30b   :  { %1205 = vmatprep.mubr.bf16.mxu1 %v1044_v37 }
 0x30c   :  { %1206 = vmatmul.mubr.bf16.vlgmr.msra.gmra.mrb[12].mxu1 %v1043_v36 }
 0x3df   :  { %v1496_v38 = vpop.f32.mrb[12].mxu1 }
 0x3e0   :  { %v1497_v39 = vpop.f32.mrb[13].mxu1 }
 0x3e1   :  { %v1498_v40 = vadd.f32 %v1497_v39, %v1496_v38  ;;  %v1499_v41 = vpop.f32.mrb[14].mxu1 }
 0x3e2   :  { %v1500_v42 = vpop.f32.mrb[15].mxu1 }
 0x3e3   :  { %v1501_v43 = vadd.f32 %v1500_v42, %v1499_v41  ;;  %v1225_v44 = vrot.slane %v1498_v40, 6  ;;  %v1215_v45 = vrot.slane %v1498_v40, 2  ;;  %v1220_v46 = vrot.slane %v1498_v40, 4 }
 0x3e5   :  { %1226 = vrot.lane.b32.xlu1 %v1225_v44, %s1711_s24  ;;  %1216 = vrot.lane.b32.xlu0 %v1215_v45, %s1712_s25  ;;  %v1240_v47 = vrot.slane %v1501_v43, 4  ;;  %v1235_v48 = vrot.slane %v1501_v43, 2  ;;  %v1245_v49 = vrot.slane %v1501_v43, 6 }
 0x3e9   :  { %1231 = vrot.lane.b32.xlu1 %v1501_v43, %s1713_s26  ;;  %1221 = vrot.lane.b32.xlu0 %v1220_v46, %s1714_s27 }
 0x3ed   :  { %1241 = vrot.lane.b32.xlu1 %v1240_v47, %s1715_s9  ;;  %1236 = vrot.lane.b32.xlu0 %v1235_v48, %s1716_s28 }
 0x3f1   :  { %1246 = vrot.lane.b32.xlu0 %v1245_v49, %s1717_s29 }
 0x457   :  { %v1227_v50 = vpop.permute.xlu1 %1226  ;;  %v1217_v51 = vpop.permute.xlu0 %1216 }
 0x458   :  { %v1219_v52 = vadd.f32 %v1498_v40, %v1217_v51 }
 0x45b   :  { %v1222_v53 = vpop.permute.xlu0 %1221  ;;  %v1232_v55 = vpop.permute.xlu1 %1231 }
 0x45c   :  { %v1224_v54 = vadd.f32 %v1222_v53, %v1219_v52 }
 0x45e   :  { %v1229_v56 = vadd.f32 %v1227_v50, %v1224_v54 }
 0x45f   :  { %v1237_v57 = vpop.permute.xlu0 %1236  ;;  %v1242_v60 = vpop.permute.xlu1 %1241 }
 0x460   :  { %v1234_v58 = vadd.f32 %v1232_v55, %v1229_v56 }
 0x462   :  { %v1239_v59 = vadd.f32 %v1237_v57, %v1234_v58 }
 0x463   :  { %v1247_v63 = vpop.permute.xlu0 %1246 }
 0x464   :  { %v1244_v61 = vadd.f32 %v1242_v60, %v1239_v59 }
 0x466   :  { %v1249_v0 = vadd.f32 %v1247_v63, %v1244_v61 }
 0x468   :  { %v1257_v1 = vadd.f32 %v1437_v62, %v1249_v0 }
 0x46a   :  { %1259 = vst.msk [vmem:[#allocation4] sm:$0x3] %vm1258_vm3, %v1257_v1 }
 0x46b   :  { %1697 = shalt.err (!%p1694_p4)
}
 0x46c   :  { %s1698_s2 = scalar_lea.hbm %s2107_s10, 32 }
 0x46d   :  { %p1699_p5 = scmp.ne.s32.totalorder %s2107_s10, %s1698_s2  ;;  %p1702_p6 = scmp.lt.u32.totalorder %s1698_s2, %s2107_s10 }
 0x46f   :  { %p1704_p7 = pnand %p1702_p6, %p1699_p5 }
 0x471   :  { %1707 = shalt.err (!%p1704_p7)
}
 0x472   :  { %1271 = dma.vmem_to_hbm [thread:$0]  %s1269_s3, 32, %s2107_s10, [#allocation5]  }
 0x473   :  { %1708 = dma.done.wait [#allocation5], 32  }
 0x474   :  { %1709 = vsyncadd [#allocation5], 4294967264 }
 0x475   :  { %1277 = vsyncpa [#allocation5], 1 }

</bundles_post_ra>
